<compile_context>
chip_gen: v6e
topology: v6e:2x2x1
jax: 0.10.0
libtpu: 0.0.40
codegen_flags: <defaults>
</compile_context>

<pallas_src>
import functools

import jax
import jax.numpy as jnp
from jax.experimental import pallas as pl
from jax.experimental.pallas import tpu as pltpu

LANE = 128
SUBLANE = 8


def _round_up(x, m):
    return ((x + m - 1) // m) * m


def _choose_tile(batch, block_b):
    """Pick (batch_tile, padded_batch).  Keeps >=2 grid steps when possible so
    the "parallel" grid axis shards across both v7x TensorCores."""
    b_pad = _round_up(max(batch, SUBLANE), SUBLANE)
    half = _round_up((b_pad + 1) // 2, SUBLANE)
    bt = max(SUBLANE, min(block_b, half))
    b_pad = _round_up(b_pad, bt)
    return bt, b_pad


def _resident_spec(shape):
    """BlockSpec for an operand that is identical on every grid step (weights,
    biases).  Single-buffered when the JAX version supports pipeline_mode —
    saves the useless second VMEM copy + DMA bookkeeping."""
    idx = lambda i, _n=len(shape): (0,) * _n
    try:
        return pl.BlockSpec(shape, idx, pipeline_mode=pl.Buffered(1))
    except (TypeError, AttributeError):
        return pl.BlockSpec(shape, idx)


def forward_policy_kernel(s_ref, w1_ref, b1_ref, w2_ref, b2_ref, out_ref):
    # dense1: (Bt, S)bf16 @ (S, H)bf16 -> f32, bias + ReLU in f32.
    h = jnp.dot(s_ref[...], w1_ref[...], preferred_element_type=jnp.float32)
    h = jnp.maximum(h + b1_ref[...], 0.0)
    # dense2: (Bt, H)bf16 @ (H, A_pad)bf16 -> f32, bias in f32.  Padded action
    # columns of w2 are 0 and padded b2 entries are -1e30.
    logits = jnp.dot(h.astype(w2_ref.dtype), w2_ref[...],
                     preferred_element_type=jnp.float32) + b2_ref[...]
    # Numerically stable softmax over the lane-padded action axis.  exp of the
    # -1e30 padded lanes underflows to exactly 0, so the denominator equals the
    # real-action sum.  Exact divide (denominator is a (bt,1) vector) so rows
    # sum to 1 to f32 precision.
    m = jnp.max(logits, axis=-1, keepdims=True)
    e = jnp.exp(logits - m)
    denom = jnp.sum(e, axis=-1, keepdims=True)
    out_ref[...] = (e * (1.0 / denom)).astype(out_ref.dtype)


def prepare_params(w1, b1, w2, b2, *, compute_dtype=jnp.bfloat16):
    """One-time layout prep: transpose PyTorch-style (out, in) weights to
    (in, out), store them in bf16 for single-pass MXU matmuls, and pad the
    action dim to a lane-dense multiple of 128."""
    hidden_dim, state_dim = w1.shape
    num_actions = w2.shape[0]
    a_pad = _round_up(num_actions, LANE)
    w1_t = jnp.asarray(w1, jnp.float32).T.astype(compute_dtype)            # (S, H)
    b1_r = jnp.asarray(b1, jnp.float32).reshape(1, hidden_dim)             # (1, H) f32
    w2_t = jnp.zeros((hidden_dim, a_pad), jnp.float32).at[:, :num_actions].set(
        jnp.asarray(w2, jnp.float32).T).astype(compute_dtype)              # (H, A_pad)
    b2_r = jnp.full((1, a_pad), -1e30, jnp.float32).at[:, :num_actions].set(
        jnp.asarray(b2, jnp.float32).reshape(1, num_actions))              # (1, A_pad) f32
    return w1_t, b1_r, w2_t, b2_r, num_actions


@functools.partial(jax.jit, static_argnames=("block_b", "out_dtype"))
def forward_policy_padded(s, w1_t, b1, w2_t, b2, *, block_b=1024,
                          out_dtype=jnp.float32):
    """Runs the Pallas kernel and returns the padded (b_pad, 128) probability
    array.  Padded action lanes are exact zeros; padded batch rows are junk.
    Perf-critical consumers should use this layout directly (no slice)."""
    batch, state_dim = s.shape
    hidden_dim = w1_t.shape[1]
    a_pad = w2_t.shape[1]
    compute_dtype = w1_t.dtype

    bt, b_pad = _choose_tile(batch, block_b)
    # Cast + pad in one wrapper op: halves the s-tile DMA bytes into the kernel.
    s = s.astype(compute_dtype)
    if b_pad != batch:
        s = jnp.pad(s, ((0, b_pad - batch), (0, 0)))
    grid = (b_pad // bt,)

    flops = 2 * b_pad * (state_dim * hidden_dim + hidden_dim * a_pad)
    bytes_accessed = (s.dtype.itemsize * b_pad * state_dim
                      + w1_t.dtype.itemsize * state_dim * hidden_dim
                      + b1.dtype.itemsize * hidden_dim
                      + w2_t.dtype.itemsize * hidden_dim * a_pad
                      + b2.dtype.itemsize * a_pad
                      + jnp.dtype(out_dtype).itemsize * b_pad * a_pad)

    return pl.pallas_call(
        forward_policy_kernel,
        out_shape=jax.ShapeDtypeStruct((b_pad, a_pad), out_dtype),
        grid_spec=pltpu.PrefetchScalarGridSpec(
            num_scalar_prefetch=0,
            grid=grid,
            in_specs=[
                pl.BlockSpec((bt, state_dim), lambda i: (i, 0)),   # s tile
                _resident_spec((state_dim, hidden_dim)),           # w1 (S, H)
                _resident_spec((1, hidden_dim)),                   # b1
                _resident_spec((hidden_dim, a_pad)),               # w2 (H, A_pad)
                _resident_spec((1, a_pad)),                        # b2 (padded)
            ],
            out_specs=pl.BlockSpec((bt, a_pad), lambda i: (i, 0)),
        ),
        compiler_params=pltpu.CompilerParams(
            dimension_semantics=("parallel",)),
        cost_estimate=pl.CostEstimate(
            flops=flops,
            transcendentals=b_pad * a_pad,
            bytes_accessed=bytes_accessed),
    )(s, w1_t, b1, w2_t, b2)


@functools.partial(jax.jit, static_argnames=("num_actions",))
def _xla_forward(s, w1_t, b1, w2_t, b2, *, num_actions):
    """Fused XLA fallback for tiny batches (Pallas launch overhead dominates)."""
    h = jnp.maximum(
        jnp.dot(s.astype(w1_t.dtype), w1_t, preferred_element_type=jnp.float32)
        + b1, 0.0)
    logits = (jnp.dot(h.astype(w2_t.dtype), w2_t,
                      preferred_element_type=jnp.float32)[:, :num_actions]
              + b2[:, :num_actions])
    return jax.nn.softmax(logits, axis=-1)


def forward_policy(s, params, *, block_b=1024, out_dtype=jnp.float32,
                   min_pallas_batch=256):
    """API-compatible wrapper returning (batch, num_actions) probabilities.
    NOTE: the trailing slice costs an extra HBM pass; hot paths should call
    forward_policy_padded() and consume the padded (B, 128) layout directly."""
    w1_t, b1, w2_t, b2, num_actions = params
    if s.shape[0] < min_pallas_batch:
        return _xla_forward(s, w1_t, b1, w2_t, b2, num_actions=num_actions)
    out = forward_policy_padded(s, w1_t, b1, w2_t, b2,
                                block_b=block_b, out_dtype=out_dtype)
    return out[:s.shape[0], :num_actions]


def init_params(key, state_dim, hidden_dim, num_actions):
    # Deterministic init mimicking nn.Linear's uniform(-1/sqrt(fan_in), ...).
    k1, k2, k3, k4 = jax.random.split(key, 4)
    bound1 = 1.0 / jnp.sqrt(jnp.float32(state_dim))
    bound2 = 1.0 / jnp.sqrt(jnp.float32(hidden_dim))
    w1 = jax.random.uniform(k1, (hidden_dim, state_dim), jnp.float32, -bound1, bound1)
    b1 = jax.random.uniform(k2, (hidden_dim,), jnp.float32, -bound1, bound1)
    w2 = jax.random.uniform(k3, (num_actions, hidden_dim), jnp.float32, -bound2, bound2)
    b2 = jax.random.uniform(k4, (num_actions,), jnp.float32, -bound2, bound2)
    return w1, b1, w2, b2


if __name__ == "__main__":
    state_dim, hidden_dim, num_actions = 16, 32, 8

    key = jax.random.PRNGKey(0)
    k_s, k_s2, k_p = jax.random.split(key, 3)
    w1, b1, w2, b2 = init_params(k_p, state_dim, hidden_dim, num_actions)
    params = prepare_params(w1, b1, w2, b2)
    w1_t, b1_r, w2_t, b2_r, na = params

    def torch_ref(x):
        h = jnp.maximum(x @ w1.T + b1[None, :], 0.0)
        return jax.nn.softmax(h @ w2.T + b2[None, :], axis=1)

    # --- small batch: exercise the Pallas kernel directly (padded layout) ---
    batch = 8
    s = jax.random.normal(k_s, (batch, state_dim), jnp.float32)
    out_pad = jax.block_until_ready(
        forward_policy_padded(s, w1_t, b1_r, w2_t, b2_r))
    out = out_pad[:batch, :na]          # test-only slice; consumers keep padded layout
    ref = torch_ref(s)
    assert out_pad.shape[1] == LANE
    assert bool(jnp.all(out_pad[:batch, na:] < 1e-30))       # pad lanes are zero
    # bf16 matmul inputs (f32 accumulate/softmax) -> loosened tolerances.
    assert jnp.allclose(out, ref, atol=2e-2, rtol=2e-2)
    assert jnp.allclose(jnp.sum(out, axis=1), 1.0, atol=1e-4)  # exact divide

    # --- larger batch: multi-tile grid (>=2 parallel steps) + batch padding ---
    batch2 = 300
    s2 = jax.random.normal(k_s2, (batch2, state_dim), jnp.float32)
    out2 = jax.block_until_ready(forward_policy(s2, params))
    ref2 = torch_ref(s2)
    assert out2.shape == (batch2, na)
    assert jnp.allclose(out2, ref2, atol=2e-2, rtol=2e-2)
    assert jnp.allclose(jnp.sum(out2, axis=1), 1.0, atol=1e-4)

    print("KERNEL_OK")
</pallas_src>

<mosaic_0001>
module attributes {stable_mosaic.version = 11 : i64} {
  func.func @forward_policy_kernel(%arg0: i32, %arg1: memref<8x16xbf16, #tpu.memory_space<vmem>>, %arg2: memref<16x32xbf16, #tpu.memory_space<vmem>>, %arg3: memref<1x32xf32, #tpu.memory_space<vmem>>, %arg4: memref<32x128xbf16, #tpu.memory_space<vmem>>, %arg5: memref<1x128xf32, #tpu.memory_space<vmem>>, %arg6: memref<8x128xf32, #tpu.memory_space<vmem>>) attributes {dimension_semantics = [#tpu.dimension_semantics<parallel>], iteration_bounds = array<i64: 1>, scalar_prefetch = 0 : i64, scratch_operands = 0 : i64, tpu.core_type = #tpu.core_type<tc>, window_params = [{transform_indices = @transform_0, window_bounds = array<i64: 8, 16>}, {pipeline_mode = #tpu.pipeline_mode<synchronous>, transform_indices = @transform_1, window_bounds = array<i64: 16, 32>}, {pipeline_mode = #tpu.pipeline_mode<synchronous>, transform_indices = @transform_2, window_bounds = array<i64: 1, 32>}, {pipeline_mode = #tpu.pipeline_mode<synchronous>, transform_indices = @transform_3, window_bounds = array<i64: 32, 128>}, {pipeline_mode = #tpu.pipeline_mode<synchronous>, transform_indices = @transform_4, window_bounds = array<i64: 1, 128>}, {transform_indices = @transform_5, window_bounds = array<i64: 8, 128>}]} {
    %c0 = arith.constant 0 : index
    %c0_0 = arith.constant 0 : index
    %0 = vector.load %arg1[%c0, %c0_0] : memref<8x16xbf16, #tpu.memory_space<vmem>>, vector<8x16xbf16>
    %c0_1 = arith.constant 0 : index
    %c0_2 = arith.constant 0 : index
    %1 = vector.load %arg2[%c0_1, %c0_2] : memref<16x32xbf16, #tpu.memory_space<vmem>>, vector<16x32xbf16>
    %cst = arith.constant dense<0.000000e+00> : vector<8x32xf32>
    %2 = tpu.matmul %0, %1, %cst {dimension_numbers = #tpu.dot_dimension_numbers<[1], [0], [0], [1], [0, 0, 1, 1], [], []>} : vector<8x16xbf16>, vector<16x32xbf16>, vector<8x32xf32> -> vector<8x32xf32>
    %c0_3 = arith.constant 0 : index
    %c0_4 = arith.constant 0 : index
    %3 = vector.load %arg3[%c0_3, %c0_4] : memref<1x32xf32, #tpu.memory_space<vmem>>, vector<1x32xf32>
    %4 = vector.broadcast %3 : vector<1x32xf32> to vector<8x32xf32>
    %5 = arith.addf %2, %4 : vector<8x32xf32>
    %cst_5 = arith.constant 0.000000e+00 : f32
    %6 = vector.broadcast %cst_5 : f32 to vector<8x32xf32>
    %7 = arith.maximumf %5, %6 : vector<8x32xf32>
    %8 = arith.truncf %7 : vector<8x32xf32> to vector<8x32xbf16>
    %c0_6 = arith.constant 0 : index
    %c0_7 = arith.constant 0 : index
    %9 = vector.load %arg4[%c0_6, %c0_7] : memref<32x128xbf16, #tpu.memory_space<vmem>>, vector<32x128xbf16>
    %cst_8 = arith.constant dense<0.000000e+00> : vector<8x128xf32>
    %10 = tpu.matmul %8, %9, %cst_8 {dimension_numbers = #tpu.dot_dimension_numbers<[1], [0], [0], [1], [0, 0, 1, 1], [], []>} : vector<8x32xbf16>, vector<32x128xbf16>, vector<8x128xf32> -> vector<8x128xf32>
    %c0_9 = arith.constant 0 : index
    %c0_10 = arith.constant 0 : index
    %11 = vector.load %arg5[%c0_9, %c0_10] : memref<1x128xf32, #tpu.memory_space<vmem>>, vector<1x128xf32>
    %12 = vector.broadcast %11 : vector<1x128xf32> to vector<8x128xf32>
    %13 = arith.addf %10, %12 : vector<8x128xf32>
    %cst_11 = arith.constant dense<0xFF800000> : vector<8xf32>
    %14 = vector.multi_reduction <maximumf>, %13, %cst_11 [1] : vector<8x128xf32> to vector<8xf32>
    %15 = vector.shape_cast %14 : vector<8xf32> to vector<8x1xf32>
    %16 = vector.broadcast %15 : vector<8x1xf32> to vector<8x128xf32>
    %17 = arith.subf %13, %16 : vector<8x128xf32>
    %18 = math.exp %17 : vector<8x128xf32>
    %cst_12 = arith.constant dense<0.000000e+00> : vector<8xf32>
    %19 = vector.multi_reduction <add>, %18, %cst_12 [1] : vector<8x128xf32> to vector<8xf32>
    %20 = vector.shape_cast %19 : vector<8xf32> to vector<8x1xf32>
    %cst_13 = arith.constant 1.000000e+00 : f32
    %21 = vector.broadcast %cst_13 : f32 to vector<8x1xf32>
    %22 = arith.divf %21, %20 : vector<8x1xf32>
    %23 = vector.broadcast %22 : vector<8x1xf32> to vector<8x128xf32>
    %24 = arith.mulf %18, %23 : vector<8x128xf32>
    %c0_14 = arith.constant 0 : index
    %c0_15 = arith.constant 0 : index
    %25 = vector.load %arg6[%c0_14, %c0_15] : memref<8x128xf32, #tpu.memory_space<vmem>>, vector<8x128xf32>
    tpu.vector_store %arg6[%c0_14, %c0_15], %24 {strides = array<i32>} : memref<8x128xf32, #tpu.memory_space<vmem>>, vector<8x128xf32>,
    return
  }
  func.func @transform_0(%arg0: i32) -> (i32, i32) {
    %c0_i32 = arith.constant 0 : i32
    %c0_i32_0 = arith.constant 0 : i32
    return %arg0, %c0_i32 : i32, i32
  }
  func.func @transform_1(%arg0: i32) -> (i32, i32) {
    %c0_i32 = arith.constant 0 : i32
    %c0_i32_0 = arith.constant 0 : i32
    %c0_i32_1 = arith.constant 0 : i32
    return %c0_i32, %c0_i32_0 : i32, i32
  }
  func.func @transform_2(%arg0: i32) -> (i32, i32) {
    %c0_i32 = arith.constant 0 : i32
    %c0_i32_0 = arith.constant 0 : i32
    %c0_i32_1 = arith.constant 0 : i32
    return %c0_i32, %c0_i32_0 : i32, i32
  }
  func.func @transform_3(%arg0: i32) -> (i32, i32) {
    %c0_i32 = arith.constant 0 : i32
    %c0_i32_0 = arith.constant 0 : i32
    %c0_i32_1 = arith.constant 0 : i32
    return %c0_i32, %c0_i32_0 : i32, i32
  }
  func.func @transform_4(%arg0: i32) -> (i32, i32) {
    %c0_i32 = arith.constant 0 : i32
    %c0_i32_0 = arith.constant 0 : i32
    %c0_i32_1 = arith.constant 0 : i32
    return %c0_i32, %c0_i32_0 : i32, i32
  }
  func.func @transform_5(%arg0: i32) -> (i32, i32) {
    %c0_i32 = arith.constant 0 : i32
    %c0_i32_0 = arith.constant 0 : i32
    return %arg0, %c0_i32 : i32, i32
  }
}

</mosaic_0001>

<bundles_post_ra>
// kernel: forward_policy_padded.1
= control target key start
LH: loop header
LB: loop body
LE: loop exit
PB: predicated region body
PF: predicated region fallthrough
CT: control target
= control target key end

     0   :  { %10 = vsyncpa [#allocation3], 0  ;;  %s331_s0 = inlined_call_operand.vmem [shape: bf16[8,16], index: 0, kind: input, shape index: {}]   ;;  %s332_s1 = inlined_call_operand.hbm [shape: bf16[16,32], index: 1, kind: input, shape index: {}]   ;;  %s333_s2 = inlined_call_operand.vmem [shape: f32[1,32], index: 2, kind: input, shape index: {}]   ;;  %s334_s3 = inlined_call_operand.vmem [shape: bf16[32,128], index: 3, kind: input, shape index: {}]   ;;  %s335_s4 = inlined_call_operand.vmem [shape: f32[1,128], index: 4, kind: input, shape index: {}]   ;;  %s336_s5 = inlined_call_operand.hbm [shape: f32[8,128], index: 5, kind: output, shape index: {}]  }
   0x1   :  { %11 = vsyncpa [#allocation4], 0  ;;  %s274_s18 = smov [#allocation2]  }
   0x2   :  { %s19_s19 = sshll.u32 %s274_s18, 4  ;;  %s20_s19 = int_to_ptr.vmem [resolvable:$true] %s19_s19 }
   0x3   :  { %s238_s20 = scalar_lea.vmem %s20_s19, 128  ;;  %p243_p1 = scmp.lt.s32.totalorder %s20_s19, %s20_s19 }
   0x4   :  { %p239_p0 = scmp.ne.s32.totalorder %s20_s19, %s238_s20  ;;  %p244_p2 = scmp.lt.s32.totalorder %s238_s20, %s238_s20 }
   0x6   :  { %p245_p3 = por %p244_p2, %p243_p1 }
   0x8   :  { %p246_p4 = pnand %p245_p3, %p239_p0 }
   0xa   :  { %249 = shalt.err (!%p246_p4)
}
   0xb   :  { %s275_s21 = smov 64   ;;  %s276_s22 = smov 4  }
   0xc   :  { %25 = dma.hbm_to_vmem [thread:$0]  %s332_s1, 128, %s20_s19, [#allocation3], %s275_s21, %s275_s21, %s276_s22  }
   0xd   :  { %270 = dma.done.wait [#allocation3], 128  }
   0xe   :  { %271 = vsyncadd [#allocation3], 4294967168  ;;  %v277_v0 = vmov 0.0   ;;  %vm278_vm0 = vmmov 0   ;;  %v223_v1 = vld [vmem:[#allocation2] sm:$0xff]   ;;  %vm52_vm1 = vcmask 130048  }
   0xf   :  { %203 = vmatprep.subr.bf16.mxu0 %v277_v0  ;;  %205 = vmatprep.mubr.msk.bf16.mxu0 %vm278_vm0, %v277_v0  ;;  %v36_v2 = vld [vmem:[%s331_s0] sm:$0xf]  ;;  %v224_v3 = vld [vmem:[%s334_s3 + $0x8] sm:$0xff]   ;;  %vm121_vm2 = vcmask 261120  }
  0x10   :  { %209 = vmatprep.subr.bf16.mxu1 %v277_v0  ;;  %213 = vmatprep.mubr.msk.bf16.mxu1 %vm278_vm0, %v277_v0  ;;  %v225_v4 = vld [vmem:[%s334_s3] sm:$0xff]  }
  0x11   :  { %204 = vmatpush3.bf16.msra.mxu0 %v223_v1  ;;  %210 = vmatpush3.bf16.msra.mxu1 %v224_v3  ;;  %v191_v5 = vld [vmem:[%s333_s2] ss:$0 sm:$0xff]  ;;  %s279_s2 = smov [#allocation5]  }
  0x12   :  { %211 = vmatprep.subr.bf16.mxu1 %v277_v0  ;;  %v194_v13 = vld [vmem:[%s335_s4] ss:$0 sm:$0xff]  ;;  %s182_s3 = sshll.u32 %s279_s2, 4  ;;  %s183_s3 = int_to_ptr.vmem [resolvable:$true] %s182_s3 }
  0x13   :  { %s250_s4 = scalar_lea.vmem %s183_s3, 128  ;;  %p255_p6 = scmp.lt.s32.totalorder %s183_s3, %s183_s3 }
  0x14   :  { %206 = vmatmul.mubr.msk.bf16.vlgmr.msra.gmra.mxu0 %vm52_vm1, %v36_v2  ;;  %p251_p5 = scmp.ne.s32.totalorder %s183_s3, %s250_s4  ;;  %p256_p7 = scmp.lt.s32.totalorder %s250_s4, %s250_s4 }
  0x15   :  { %212 = vmatpush3.bf16.msra.mxu1 %v225_v4 }
  0x16   :  { %p257_p8 = por %p256_p7, %p255_p6 }
  0x18   :  { %p258_p9 = pnand %p257_p8, %p251_p5 }
  0xd4   :  { %v90_v6 = vpop.f32.mrf.mxu0 }
  0xd5   :  { %v91_v7 = vadd.f32 %v191_v5, %v90_v6 }
  0xd6   :  { %v207_v8 = vpop.f32.mrf.mxu0 }
  0xd7   :  { %v96_v9 = vmax.f32 %v91_v7, 0.0 }
  0xd8   :  { %v93_v10 = vpop.f32.mrf.mxu0 }
  0xd9   :  { %v97_v11 = vpack.c.bf16 %v96_v9, %v96_v9 }
  0xda   :  { %v208_v12 = vpop.f32.mrf.mxu0 }
  0xdb   :  { %214 = vmatmul.mubr.msk.bf16.vlgmr.msra.gmra.mxu1 %vm121_vm2, %v97_v11 }
 0x19b   :  { %v159_v14 = vpop.f32.mrf.mxu1 }
 0x19c   :  { %v160_v15 = vadd.f32 %v194_v13, %v159_v14 }
 0x19d   :  { %v215_v16 = vpop.f32.mrf.mxu1 }
 0x19e   :  { %165 = vmax.xlane.f32.xlu0 %v160_v15 }
 0x19f   :  { %v162_v17 = vpop.f32.mrf.mxu1 }
 0x1a1   :  { %v216_v18 = vpop.f32.mrf.mxu1 }
 0x227   :  { %v166_v19 = vpop.xlane.xlu0 %165 }
 0x228   :  { %v167_v20 = vsub.f32 %v160_v15, %v166_v19 }
 0x22a   :  { %v168_v21 = vmul.f32 1.442695, %v167_v20 }
 0x22c   :  { %226 = vpow2.f32 %v168_v21 }
 0x239   :  { %v227_v22 = vpop.eup %226 }
 0x23a   :  { %170 = vadd.xlane.f32.xlu0 %v227_v22 }
 0x2c3   :  { %v171_v23 = vpop.xlane.xlu0 %170 }
 0x2c4   :  { %228 = vrcp.f32 %v171_v23 }
 0x2d1   :  { %v229_v24 = vpop.eup %228 }
 0x2d2   :  { %v174_v25 = vmul.f32 %v229_v24, %v227_v22 }
 0x2d4   :  { %175 = vst [vmem:[#allocation5] sm:$0xff] %v174_v25 }
 0x2d5   :  { %261 = shalt.err (!%p258_p9)
}
 0x2d6   :  { %185 = dma.vmem_to_hbm [thread:$0]  %s183_s3, 128, %s336_s5, [#allocation4]  }
 0x2d7   :  { %272 = dma.done.wait [#allocation4], 128  }
 0x2d8   :  { %273 = vsyncadd [#allocation4], 4294967168 }
 0x2d9   :  { %189 = vsyncpa [#allocation3], 1 }
 0x2da   :  { %190 = vsyncpa [#allocation4], 1 }

</bundles_post_ra>
